<compile_context>
chip_gen: v7x
topology: tpu7x:2x2x1
jax: 0.10.0
libtpu: 0.0.40
codegen_flags: <defaults>
</compile_context>

<pallas_src>
import functools

import jax
import jax.numpy as jnp
from jax.experimental import pallas as pl
from jax.experimental.pallas import tpu as pltpu


def _pt_kernel(v_ref, qa1_ref, ka1_ref, pwi_ref, pwj_ref,
               w_pos2_ref, b_pos2_ref, w_pc_ref, b_a1_ref,
               w_a2_ref, b_a2_ref, out_ref):
    """One (batch, j-tile) grid step.

    v:    (1, tile_j, inner)  value rows of this j tile
    qa1:  (1, N, hdm)         q @ Wa1_blockdiag  (i side, resident)
    ka1:  (1, tile_j, hdm)    k @ Wa1_blockdiag  (j side)
    pwi:  (1, N, ph)          pos @ W_pos1 + b_pos1   (i side, resident)
    pwj:  (1, tile_j, ph)     pos @ W_pos1            (j side)
    w_pos2 (ph, inner) bf16;  w_pc = W_pos2 @ Wa1_blockdiag (ph, hdm) bf16;
    b_a1   (1, hdm) f32 effective bias (b_a1 + b_pos2 @ Wa1);
    w_a2   (hdm, inner) bf16 block-diagonal; b_a2 (1, inner) f32.
    out:  (1, N, inner) f32 accumulator, resident across the j-tile axis.
    """
    t = pl.program_id(1)

    v = v_ref[0]                       # (tj, inner) f32
    qa1 = qa1_ref[0]                   # (N, hdm)
    ka1 = ka1_ref[0]                   # (tj, hdm)
    pwi = pwi_ref[0]                   # (N, ph)
    pwj = pwj_ref[0]                   # (tj, ph)
    n = qa1.shape[0]
    tj, inner = v.shape

    # pos_mlp: ReLU of the factored first layer (VPU only in pair space).
    hpos = jnp.maximum(pwi[:, None, :] - pwj[None, :, :], 0.0)     # (N, tj, ph)
    hpos_b = hpos.reshape(n * tj, -1).astype(jnp.bfloat16)

    # rel_pos_emb (needed for the value path): Linear(ph, inner) on the MXU.
    rpe = (jnp.dot(hpos_b, w_pos2_ref[...],
                   preferred_element_type=jnp.float32)
           + b_pos2_ref[...])                                       # (N*tj, inner) f32

    # attn_mlp layer-1, factored: hpos @ (Wpos2 @ Wa1) + qa1_i - ka1_j + b_eff.
    pre = jnp.dot(hpos_b, w_pc_ref[...],
                  preferred_element_type=jnp.float32)               # (N*tj, hdm) f32
    hid = jnp.maximum(pre.reshape(n, tj, -1)
                      + qa1[:, None, :] - ka1[None, :, :]
                      + b_a1_ref[...], 0.0)                         # (N, tj, hdm)

    # attn_mlp layer-2 (block-diagonal, lane-full K=hdm MXU pass).
    sim = (jnp.dot(hid.reshape(n * tj, -1).astype(jnp.bfloat16), w_a2_ref[...],
                   preferred_element_type=jnp.float32)
           + b_a2_ref[...]).reshape(n, tj, inner)                   # (N, tj, inner)

    # softmax over i (axis 0) -- exact within this j tile (f32).
    m = jnp.max(sim, axis=0, keepdims=True)
    e = jnp.exp(sim - m)
    denom = jnp.sum(e, axis=0, keepdims=True)
    attn = e * pl.reciprocal(denom, approx=True)

    # v_pair[i, j] = v[j] + rel_pos_emb[i, j]; aggregate over j.
    v_pair = v[None, :, :] + rpe.reshape(n, tj, inner)
    agg = jnp.sum(attn * v_pair, axis=1)                            # (N, inner)

    # Lane-dense accumulation into the resident (N, inner) output block.
    @pl.when(t == 0)
    def _():
        out_ref[...] = agg[None].astype(out_ref.dtype)

    @pl.when(t > 0)
    def _():
        out_ref[...] = out_ref[...] + agg[None].astype(out_ref.dtype)


def _block_diag(mats):
    h = len(mats)
    r, c = mats[0].shape
    out = jnp.zeros((h * r, h * c), mats[0].dtype)
    for i, m in enumerate(mats):
        out = out.at[i * r:(i + 1) * r, i * c:(i + 1) * c].set(m)
    return out


def _choose_tile_j(n, inner, hdm, ph, budget_bytes=6 << 20):
    # ~bytes of live pair-space temps per (i, j) pair inside the kernel.
    row_bytes = 4 * (ph + 5 * inner + 2 * hdm) + 2 * (ph + hdm)
    if n < 8 or n * n * row_bytes <= budget_bytes:
        return n
    best = None
    for tj in range(8, n, 8):
        if n % tj == 0 and n * tj * row_bytes <= budget_bytes:
            best = tj
    return best if best is not None else (8 if n % 8 == 0 else n)


def init_params(key, *, dim, heads, dim_head, pos_mlp_hidden_dim,
                attn_mlp_hidden_mult):
    inner = heads * dim_head
    dm = dim_head * attn_mlp_hidden_mult
    ks = jax.random.split(key, 10)
    s = 0.1
    f32 = jnp.float32
    return dict(
        w_qkv=jax.random.normal(ks[0], (dim, inner * 3), f32) * s,
        w_pos1=jax.random.normal(ks[1], (3, pos_mlp_hidden_dim), f32) * s,
        b_pos1=jax.random.normal(ks[2], (1, pos_mlp_hidden_dim), f32) * s,
        w_pos2=jax.random.normal(ks[3], (pos_mlp_hidden_dim, inner), f32) * s,
        b_pos2=jax.random.normal(ks[4], (1, inner), f32) * s,
        w_a1=jax.random.normal(ks[5], (heads, dim_head, dm), f32) * s,
        b_a1=jax.random.normal(ks[6], (heads, 1, dm), f32) * s,
        w_a2=jax.random.normal(ks[7], (heads, dm, dim_head), f32) * s,
        b_a2=jax.random.normal(ks[8], (heads, 1, dim_head), f32) * s,
        w_out=jax.random.normal(ks[9], (inner, dim), f32) * s,
        b_out=jnp.zeros((dim,), f32),
    )


@functools.partial(jax.jit, static_argnames=("heads",))
def multihead_point_transformer_layer(x, pos, params, *, heads):
    B, N, _ = x.shape
    inner = params['w_qkv'].shape[1] // 3
    dm = params['w_a1'].shape[-1]
    hdm = heads * dm
    ph = params['w_pos1'].shape[-1]

    # ---- glue (plain JAX, all O(N) not O(N^2)) -----------------------------
    qkv = x @ params['w_qkv']
    q, k, v = jnp.split(qkv, 3, axis=-1)                  # each (B, N, inner)
    pw = pos @ params['w_pos1']                           # (B, N, ph), K=3 once per point
    pwi = pw + params['b_pos1']                           # i side carries the bias
    pwj = pw

    # Block-diagonal grouped attn_mlp weights (f32 for composition).
    w_a1_bd = _block_diag([params['w_a1'][h] for h in range(heads)])          # (inner, hdm)
    w_a2_bd = _block_diag([params['w_a2'][h] for h in range(heads)]).astype(jnp.bfloat16)
    b_a1_bd = params['b_a1'].reshape(1, hdm)
    b_a2_bd = params['b_a2'].reshape(1, inner)

    # Factor attn_mlp layer-1 out of pair space.
    qa1 = q @ w_a1_bd                                                          # (B, N, hdm)
    ka1 = k @ w_a1_bd                                                          # (B, N, hdm)
    w_pos2a1 = (params['w_pos2'] @ w_a1_bd).astype(jnp.bfloat16)               # (ph, hdm)
    b_a1_eff = b_a1_bd + params['b_pos2'] @ w_a1_bd                            # (1, hdm)
    w_pos2 = params['w_pos2'].astype(jnp.bfloat16)
    b_pos2 = params['b_pos2']

    tile_j = _choose_tile_j(N, inner, hdm, ph)
    T = N // tile_j

    # VMEM budget: pair-space temps + double-buffered IO + weights, 2x headroom.
    pair_bytes = N * tile_j * (4 * (ph + 5 * inner + 2 * hdm) + 2 * (ph + hdm))
    io_bytes = 4 * 2 * (N * (2 * inner + hdm + ph)
                        + tile_j * (inner + hdm + ph))
    w_bytes = 2 * (ph * (inner + hdm) + hdm * inner) + 4 * (2 * inner + hdm)
    vmem_limit = int(min(max(2 * (pair_bytes + io_bytes + w_bytes), 16 << 20), 48 << 20))

    cost = pl.CostEstimate(
        flops=int(2 * B * N * N * (ph * (inner + hdm) + hdm * inner)
                  + 16 * B * N * N * max(inner, hdm)),
        transcendentals=int(2 * B * N * N * inner),
        bytes_accessed=int(4 * B * N * (3 * inner + 2 * hdm + 2 * ph)),
    )

    agg = pl.pallas_call(
        _pt_kernel,
        out_shape=jax.ShapeDtypeStruct((B, N, inner), jnp.float32),
        grid_spec=pltpu.PrefetchScalarGridSpec(
            num_scalar_prefetch=0,
            grid=(B, T),
            in_specs=[
                pl.BlockSpec((1, tile_j, inner), lambda b, t: (b, t, 0)),  # v tile
                pl.BlockSpec((1, N, hdm), lambda b, t: (b, 0, 0)),         # qa1 (full)
                pl.BlockSpec((1, tile_j, hdm), lambda b, t: (b, t, 0)),    # ka1 tile
                pl.BlockSpec((1, N, ph), lambda b, t: (b, 0, 0)),          # pwi (full)
                pl.BlockSpec((1, tile_j, ph), lambda b, t: (b, t, 0)),     # pwj tile
                pl.BlockSpec((ph, inner), lambda b, t: (0, 0)),            # w_pos2 bf16
                pl.BlockSpec((1, inner), lambda b, t: (0, 0)),             # b_pos2
                pl.BlockSpec((ph, hdm), lambda b, t: (0, 0)),              # w_pos2 @ w_a1 bf16
                pl.BlockSpec((1, hdm), lambda b, t: (0, 0)),               # b_a1 effective
                pl.BlockSpec((hdm, inner), lambda b, t: (0, 0)),           # w_a2 blockdiag bf16
                pl.BlockSpec((1, inner), lambda b, t: (0, 0)),             # b_a2
            ],
            out_specs=pl.BlockSpec((1, N, inner), lambda b, t: (b, 0, 0)),
        ),
        compiler_params=pltpu.CompilerParams(
            dimension_semantics=("parallel", "arbitrary"),
            vmem_limit_bytes=vmem_limit),
        cost_estimate=cost,
    )(v, qa1, ka1, pwi, pwj, w_pos2, b_pos2, w_pos2a1, b_a1_eff, w_a2_bd, b_a2_bd)

    # to_out (glue): Linear(inner, dim)
    return agg @ params['w_out'] + params['b_out']


def reference_forward(x, pos, p, *, heads):
    # Pure-JAX f32 mirror of the PyTorch forward (mask=None, num_neighbors=None).
    B, N, _ = x.shape
    inner = p['w_qkv'].shape[1] // 3
    d = inner // heads
    qkv = x @ p['w_qkv']
    q, k, v = jnp.split(qkv, 3, axis=-1)
    rel_pos = pos[:, :, None, :] - pos[:, None, :, :]          # (B,N,N,3)
    hpos = jax.nn.relu(rel_pos @ p['w_pos1'] + p['b_pos1'][0])
    rel_pos_emb = hpos @ p['w_pos2'] + p['b_pos2'][0]          # (B,N,N,inner)
    qk_rel = q[:, :, None, :] - k[:, None, :, :]               # (B,N,N,inner)
    v_exp = v[:, None, :, :] + rel_pos_emb                     # v[b,j] + emb[b,i,j]
    attn_in = (qk_rel + rel_pos_emb).reshape(B, N, N, heads, d)
    hid = jax.nn.relu(jnp.einsum('bijhd,hde->bijhe', attn_in, p['w_a1'])
                      + p['b_a1'][:, 0])
    sim = (jnp.einsum('bijhe,hed->bijhd', hid, p['w_a2'])
           + p['b_a2'][:, 0]).reshape(B, N, N, inner)
    attn = jax.nn.softmax(sim, axis=1)                         # softmax over i
    agg = jnp.sum(attn * v_exp, axis=2)                        # sum over j
    return agg @ p['w_out'] + p['b_out']


if __name__ == "__main__":
    B, N, DIM = 2, 8, 32
    HEADS, DIM_HEAD = 4, 32           # inner_dim = 128 (lane-full)
    POS_HID, MULT = 32, 2             # per-head hidden = 64 -> heads*dm = 256

    key = jax.random.PRNGKey(0)
    kx, kp, kw = jax.random.split(key, 3)
    x = jax.random.normal(kx, (B, N, DIM), jnp.float32)
    pos = jax.random.normal(kp, (B, N, 3), jnp.float32)
    params = init_params(kw, dim=DIM, heads=HEADS, dim_head=DIM_HEAD,
                         pos_mlp_hidden_dim=POS_HID, attn_mlp_hidden_mult=MULT)

    out = multihead_point_transformer_layer(x, pos, params, heads=HEADS)
    out = jax.block_until_ready(out)
    assert out.shape == (B, N, DIM)

    ref = reference_forward(x, pos, params, heads=HEADS)
    if bool(jnp.allclose(out, ref, atol=5e-2, rtol=5e-2)):
        print("KERNEL_OK")
    else:
        err = float(jnp.max(jnp.abs(out - ref)))
        print(f"MISMATCH max_abs_err={err}")
</pallas_src>

<mosaic_0001>
module attributes {stable_mosaic.version = 11 : i64} {
  func.func @_pt_kernel(%arg0: i32, %arg1: i32, %arg2: memref<1x8x128xf32, #tpu.memory_space<vmem>>, %arg3: memref<1x8x256xf32, #tpu.memory_space<vmem>>, %arg4: memref<1x8x256xf32, #tpu.memory_space<vmem>>, %arg5: memref<1x8x32xf32, #tpu.memory_space<vmem>>, %arg6: memref<1x8x32xf32, #tpu.memory_space<vmem>>, %arg7: memref<32x128xbf16, #tpu.memory_space<vmem>>, %arg8: memref<1x128xf32, #tpu.memory_space<vmem>>, %arg9: memref<32x256xbf16, #tpu.memory_space<vmem>>, %arg10: memref<1x256xf32, #tpu.memory_space<vmem>>, %arg11: memref<256x128xbf16, #tpu.memory_space<vmem>>, %arg12: memref<1x128xf32, #tpu.memory_space<vmem>>, %arg13: memref<1x8x128xf32, #tpu.memory_space<vmem>>) attributes {dimension_semantics = [#tpu.dimension_semantics<parallel>, #tpu.dimension_semantics<arbitrary>], iteration_bounds = array<i64: 2, 1>, scalar_prefetch = 0 : i64, scratch_operands = 0 : i64, tpu.core_type = #tpu.core_type<tc>, window_params = [{transform_indices = @transform_0, window_bounds = array<i64: 1, 8, 128>}, {transform_indices = @transform_1, window_bounds = array<i64: 1, 8, 256>}, {transform_indices = @transform_2, window_bounds = array<i64: 1, 8, 256>}, {transform_indices = @transform_3, window_bounds = array<i64: 1, 8, 32>}, {transform_indices = @transform_4, window_bounds = array<i64: 1, 8, 32>}, {pipeline_mode = #tpu.pipeline_mode<synchronous>, transform_indices = @transform_5, window_bounds = array<i64: 32, 128>}, {pipeline_mode = #tpu.pipeline_mode<synchronous>, transform_indices = @transform_6, window_bounds = array<i64: 1, 128>}, {pipeline_mode = #tpu.pipeline_mode<synchronous>, transform_indices = @transform_7, window_bounds = array<i64: 32, 256>}, {pipeline_mode = #tpu.pipeline_mode<synchronous>, transform_indices = @transform_8, window_bounds = array<i64: 1, 256>}, {pipeline_mode = #tpu.pipeline_mode<synchronous>, transform_indices = @transform_9, window_bounds = array<i64: 256, 128>}, {pipeline_mode = #tpu.pipeline_mode<synchronous>, transform_indices = @transform_10, window_bounds = array<i64: 1, 128>}, {transform_indices = @transform_11, window_bounds = array<i64: 1, 8, 128>}]} {
    %c0 = arith.constant 0 : index
    %c0_0 = arith.constant 0 : index
    %c0_1 = arith.constant 0 : index
    %0 = vector.load %arg2[%c0, %c0_0, %c0_1] : memref<1x8x128xf32, #tpu.memory_space<vmem>>, vector<1x8x128xf32>
    %1 = vector.shape_cast %0 : vector<1x8x128xf32> to vector<8x128xf32>
    %c0_2 = arith.constant 0 : index
    %c0_3 = arith.constant 0 : index
    %c0_4 = arith.constant 0 : index
    %2 = vector.load %arg3[%c0_2, %c0_3, %c0_4] : memref<1x8x256xf32, #tpu.memory_space<vmem>>, vector<1x8x256xf32>
    %3 = vector.shape_cast %2 : vector<1x8x256xf32> to vector<8x256xf32>
    %c0_5 = arith.constant 0 : index
    %c0_6 = arith.constant 0 : index
    %c0_7 = arith.constant 0 : index
    %4 = vector.load %arg4[%c0_5, %c0_6, %c0_7] : memref<1x8x256xf32, #tpu.memory_space<vmem>>, vector<1x8x256xf32>
    %5 = vector.shape_cast %4 : vector<1x8x256xf32> to vector<8x256xf32>
    %c0_8 = arith.constant 0 : index
    %c0_9 = arith.constant 0 : index
    %c0_10 = arith.constant 0 : index
    %6 = vector.load %arg5[%c0_8, %c0_9, %c0_10] : memref<1x8x32xf32, #tpu.memory_space<vmem>>, vector<1x8x32xf32>
    %7 = vector.shape_cast %6 : vector<1x8x32xf32> to vector<8x32xf32>
    %c0_11 = arith.constant 0 : index
    %c0_12 = arith.constant 0 : index
    %c0_13 = arith.constant 0 : index
    %8 = vector.load %arg6[%c0_11, %c0_12, %c0_13] : memref<1x8x32xf32, #tpu.memory_space<vmem>>, vector<1x8x32xf32>
    %9 = vector.shape_cast %8 : vector<1x8x32xf32> to vector<8x32xf32>
    %10 = vector.shape_cast %7 : vector<8x32xf32> to vector<8x1x32xf32>
    %11 = vector.shape_cast %9 : vector<8x32xf32> to vector<1x8x32xf32>
    %12 = vector.broadcast %10 : vector<8x1x32xf32> to vector<8x8x32xf32>
    %13 = vector.broadcast %11 : vector<1x8x32xf32> to vector<8x8x32xf32>
    %14 = arith.subf %12, %13 : vector<8x8x32xf32>
    %cst = arith.constant 0.000000e+00 : f32
    %15 = vector.broadcast %cst : f32 to vector<8x8x32xf32>
    %16 = arith.maximumf %14, %15 : vector<8x8x32xf32>
    %17 = vector.shape_cast %16 : vector<8x8x32xf32> to vector<64x32xf32>
    %18 = arith.truncf %17 : vector<64x32xf32> to vector<64x32xbf16>
    %c0_14 = arith.constant 0 : index
    %c0_15 = arith.constant 0 : index
    %19 = vector.load %arg7[%c0_14, %c0_15] : memref<32x128xbf16, #tpu.memory_space<vmem>>, vector<32x128xbf16>
    %cst_16 = arith.constant dense<0.000000e+00> : vector<64x128xf32>
    %20 = tpu.matmul %18, %19, %cst_16 {dimension_numbers = #tpu.dot_dimension_numbers<[1], [0], [0], [1], [0, 0, 1, 1], [], []>} : vector<64x32xbf16>, vector<32x128xbf16>, vector<64x128xf32> -> vector<64x128xf32>
    %c0_17 = arith.constant 0 : index
    %c0_18 = arith.constant 0 : index
    %21 = vector.load %arg8[%c0_17, %c0_18] : memref<1x128xf32, #tpu.memory_space<vmem>>, vector<1x128xf32>
    %22 = vector.broadcast %21 : vector<1x128xf32> to vector<64x128xf32>
    %23 = arith.addf %20, %22 : vector<64x128xf32>
    %c0_19 = arith.constant 0 : index
    %c0_20 = arith.constant 0 : index
    %24 = vector.load %arg9[%c0_19, %c0_20] : memref<32x256xbf16, #tpu.memory_space<vmem>>, vector<32x256xbf16>
    %cst_21 = arith.constant dense<0.000000e+00> : vector<64x256xf32>
    %25 = tpu.matmul %18, %24, %cst_21 {dimension_numbers = #tpu.dot_dimension_numbers<[1], [0], [0], [1], [0, 0, 1, 1], [], []>} : vector<64x32xbf16>, vector<32x256xbf16>, vector<64x256xf32> -> vector<64x256xf32>
    %26 = vector.shape_cast %25 : vector<64x256xf32> to vector<8x8x256xf32>
    %27 = vector.shape_cast %3 : vector<8x256xf32> to vector<8x1x256xf32>
    %28 = vector.broadcast %27 : vector<8x1x256xf32> to vector<8x8x256xf32>
    %29 = arith.addf %26, %28 : vector<8x8x256xf32>
    %30 = vector.shape_cast %5 : vector<8x256xf32> to vector<1x8x256xf32>
    %31 = vector.broadcast %30 : vector<1x8x256xf32> to vector<8x8x256xf32>
    %32 = arith.subf %29, %31 : vector<8x8x256xf32>
    %c0_22 = arith.constant 0 : index
    %c0_23 = arith.constant 0 : index
    %33 = vector.load %arg10[%c0_22, %c0_23] : memref<1x256xf32, #tpu.memory_space<vmem>>, vector<1x256xf32>
    %34 = vector.shape_cast %33 : vector<1x256xf32> to vector<1x1x256xf32>
    %35 = vector.broadcast %34 : vector<1x1x256xf32> to vector<8x8x256xf32>
    %36 = arith.addf %32, %35 : vector<8x8x256xf32>
    %cst_24 = arith.constant 0.000000e+00 : f32
    %37 = vector.broadcast %cst_24 : f32 to vector<8x8x256xf32>
    %38 = arith.maximumf %36, %37 : vector<8x8x256xf32>
    %39 = vector.shape_cast %38 : vector<8x8x256xf32> to vector<64x256xf32>
    %40 = arith.truncf %39 : vector<64x256xf32> to vector<64x256xbf16>
    %c0_25 = arith.constant 0 : index
    %c0_26 = arith.constant 0 : index
    %41 = vector.load %arg11[%c0_25, %c0_26] : memref<256x128xbf16, #tpu.memory_space<vmem>>, vector<256x128xbf16>
    %cst_27 = arith.constant dense<0.000000e+00> : vector<64x128xf32>
    %42 = tpu.matmul %40, %41, %cst_27 {dimension_numbers = #tpu.dot_dimension_numbers<[1], [0], [0], [1], [0, 0, 1, 1], [], []>} : vector<64x256xbf16>, vector<256x128xbf16>, vector<64x128xf32> -> vector<64x128xf32>
    %c0_28 = arith.constant 0 : index
    %c0_29 = arith.constant 0 : index
    %43 = vector.load %arg12[%c0_28, %c0_29] : memref<1x128xf32, #tpu.memory_space<vmem>>, vector<1x128xf32>
    %44 = vector.broadcast %43 : vector<1x128xf32> to vector<64x128xf32>
    %45 = arith.addf %42, %44 : vector<64x128xf32>
    %46 = vector.shape_cast %45 : vector<64x128xf32> to vector<8x8x128xf32>
    %cst_30 = arith.constant dense<0xFF800000> : vector<8x128xf32>
    %47 = vector.multi_reduction <maximumf>, %46, %cst_30 [0] : vector<8x8x128xf32> to vector<8x128xf32>
    %48 = vector.shape_cast %47 : vector<8x128xf32> to vector<1x8x128xf32>
    %49 = vector.broadcast %48 : vector<1x8x128xf32> to vector<8x8x128xf32>
    %50 = arith.subf %46, %49 : vector<8x8x128xf32>
    %51 = math.exp %50 : vector<8x8x128xf32>
    %cst_31 = arith.constant dense<0.000000e+00> : vector<8x128xf32>
    %52 = vector.multi_reduction <add>, %51, %cst_31 [0] : vector<8x8x128xf32> to vector<8x128xf32>
    %53 = vector.shape_cast %52 : vector<8x128xf32> to vector<1x8x128xf32>
    %54 = tpu.reciprocal %53 {approx = true} : vector<1x8x128xf32> -> vector<1x8x128xf32>
    %55 = vector.broadcast %54 : vector<1x8x128xf32> to vector<8x8x128xf32>
    %56 = arith.mulf %51, %55 : vector<8x8x128xf32>
    %57 = vector.shape_cast %1 : vector<8x128xf32> to vector<1x8x128xf32>
    %58 = vector.shape_cast %23 : vector<64x128xf32> to vector<8x8x128xf32>
    %59 = vector.broadcast %57 : vector<1x8x128xf32> to vector<8x8x128xf32>
    %60 = arith.addf %59, %58 : vector<8x8x128xf32>
    %61 = arith.mulf %56, %60 : vector<8x8x128xf32>
    %cst_32 = arith.constant dense<0.000000e+00> : vector<8x128xf32>
    %62 = vector.multi_reduction <add>, %61, %cst_32 [1] : vector<8x8x128xf32> to vector<8x128xf32>
    %c0_i32 = arith.constant 0 : i32
    %63 = arith.cmpi eq, %arg1, %c0_i32 : i32
    %64 = arith.extui %63 : i1 to i32
    %c0_i32_33 = arith.constant 0 : i32
    %65 = arith.cmpi ne, %64, %c0_i32_33 : i32
    scf.if %65 {
      %69 = vector.shape_cast %62 : vector<8x128xf32> to vector<1x8x128xf32>
      %c0_36 = arith.constant 0 : index
      %c0_37 = arith.constant 0 : index
      %c0_38 = arith.constant 0 : index
      %70 = vector.load %arg13[%c0_36, %c0_37, %c0_38] : memref<1x8x128xf32, #tpu.memory_space<vmem>>, vector<1x8x128xf32>
      tpu.vector_store %arg13[%c0_36, %c0_37, %c0_38], %69 {strides = array<i32>} : memref<1x8x128xf32, #tpu.memory_space<vmem>>, vector<1x8x128xf32>,
    } else {
    }
    %c0_i32_34 = arith.constant 0 : i32
    %66 = arith.cmpi sgt, %arg1, %c0_i32_34 : i32
    %67 = arith.extui %66 : i1 to i32
    %c0_i32_35 = arith.constant 0 : i32
    %68 = arith.cmpi ne, %67, %c0_i32_35 : i32
    scf.if %68 {
      %c0_36 = arith.constant 0 : index
      %c0_37 = arith.constant 0 : index
      %c0_38 = arith.constant 0 : index
      %69 = vector.load %arg13[%c0_36, %c0_37, %c0_38] : memref<1x8x128xf32, #tpu.memory_space<vmem>>, vector<1x8x128xf32>
      %70 = vector.shape_cast %62 : vector<8x128xf32> to vector<1x8x128xf32>
      %71 = arith.addf %69, %70 : vector<1x8x128xf32>
      %c0_39 = arith.constant 0 : index
      %c0_40 = arith.constant 0 : index
      %c0_41 = arith.constant 0 : index
      %72 = vector.load %arg13[%c0_39, %c0_40, %c0_41] : memref<1x8x128xf32, #tpu.memory_space<vmem>>, vector<1x8x128xf32>
      tpu.vector_store %arg13[%c0_39, %c0_40, %c0_41], %71 {strides = array<i32>} : memref<1x8x128xf32, #tpu.memory_space<vmem>>, vector<1x8x128xf32>,
    } else {
    }
    return
  }
  func.func @transform_0(%arg0: i32, %arg1: i32) -> (i32, i32, i32) {
    %c0_i32 = arith.constant 0 : i32
    %c0_i32_0 = arith.constant 0 : i32
    return %arg0, %arg1, %c0_i32 : i32, i32, i32
  }
  func.func @transform_1(%arg0: i32, %arg1: i32) -> (i32, i32, i32) {
    %c0_i32 = arith.constant 0 : i32
    %c0_i32_0 = arith.constant 0 : i32
    %c0_i32_1 = arith.constant 0 : i32
    return %arg0, %c0_i32, %c0_i32_0 : i32, i32, i32
  }
  func.func @transform_2(%arg0: i32, %arg1: i32) -> (i32, i32, i32) {
    %c0_i32 = arith.constant 0 : i32
    %c0_i32_0 = arith.constant 0 : i32
    return %arg0, %arg1, %c0_i32 : i32, i32, i32
  }
  func.func @transform_3(%arg0: i32, %arg1: i32) -> (i32, i32, i32) {
    %c0_i32 = arith.constant 0 : i32
    %c0_i32_0 = arith.constant 0 : i32
    %c0_i32_1 = arith.constant 0 : i32
    return %arg0, %c0_i32, %c0_i32_0 : i32, i32, i32
  }
  func.func @transform_4(%arg0: i32, %arg1: i32) -> (i32, i32, i32) {
    %c0_i32 = arith.constant 0 : i32
    %c0_i32_0 = arith.constant 0 : i32
    return %arg0, %arg1, %c0_i32 : i32, i32, i32
  }
  func.func @transform_5(%arg0: i32, %arg1: i32) -> (i32, i32) {
    %c0_i32 = arith.constant 0 : i32
    %c0_i32_0 = arith.constant 0 : i32
    %c0_i32_1 = arith.constant 0 : i32
    return %c0_i32, %c0_i32_0 : i32, i32
  }
  func.func @transform_6(%arg0: i32, %arg1: i32) -> (i32, i32) {
    %c0_i32 = arith.constant 0 : i32
    %c0_i32_0 = arith.constant 0 : i32
    %c0_i32_1 = arith.constant 0 : i32
    return %c0_i32, %c0_i32_0 : i32, i32
  }
  func.func @transform_7(%arg0: i32, %arg1: i32) -> (i32, i32) {
    %c0_i32 = arith.constant 0 : i32
    %c0_i32_0 = arith.constant 0 : i32
    %c0_i32_1 = arith.constant 0 : i32
    return %c0_i32, %c0_i32_0 : i32, i32
  }
  func.func @transform_8(%arg0: i32, %arg1: i32) -> (i32, i32) {
    %c0_i32 = arith.constant 0 : i32
    %c0_i32_0 = arith.constant 0 : i32
    %c0_i32_1 = arith.constant 0 : i32
    return %c0_i32, %c0_i32_0 : i32, i32
  }
  func.func @transform_9(%arg0: i32, %arg1: i32) -> (i32, i32) {
    %c0_i32 = arith.constant 0 : i32
    %c0_i32_0 = arith.constant 0 : i32
    %c0_i32_1 = arith.constant 0 : i32
    return %c0_i32, %c0_i32_0 : i32, i32
  }
  func.func @transform_10(%arg0: i32, %arg1: i32) -> (i32, i32) {
    %c0_i32 = arith.constant 0 : i32
    %c0_i32_0 = arith.constant 0 : i32
    %c0_i32_1 = arith.constant 0 : i32
    return %c0_i32, %c0_i32_0 : i32, i32
  }
  func.func @transform_11(%arg0: i32, %arg1: i32) -> (i32, i32, i32) {
    %c0_i32 = arith.constant 0 : i32
    %c0_i32_0 = arith.constant 0 : i32
    %c0_i32_1 = arith.constant 0 : i32
    return %arg0, %c0_i32, %c0_i32_0 : i32, i32, i32
  }
}

</mosaic_0001>

<bundles_post_ra>
// kernel: multihead_point_transformer_layer.1
= control target key start
LH: loop header
LB: loop body
LE: loop exit
PB: predicated region body
PF: predicated region fallthrough
CT: control target
= control target key end

     0   :  { %s1810_s17 = smov 0   ;;  %s1812_s18 = smov 0   ;;  %s2073_s0 = inlined_call_operand.vmem [shape: f32[2,8,128], index: 0, kind: input, shape index: {}]   ;;  %s2074_s1 = inlined_call_operand.vmem [shape: f32[2,8,256], index: 1, kind: input, shape index: {}]   ;;  %s2075_s2 = inlined_call_operand.vmem [shape: f32[2,8,256], index: 2, kind: input, shape index: {}]   ;;  %s2076_s3 = inlined_call_operand.vmem [shape: f32[2,8,32], index: 3, kind: input, shape index: {}]   ;;  %s2077_s4 = inlined_call_operand.vmem [shape: f32[2,8,32], index: 4, kind: input, shape index: {}]   ;;  %s2078_s5 = inlined_call_operand.vmem [shape: bf16[32,128], index: 5, kind: input, shape index: {}]   ;;  %s2079_s6 = inlined_call_operand.vmem [shape: f32[1,128], index: 6, kind: input, shape index: {}]   ;;  %s2080_s7 = inlined_call_operand.vmem [shape: bf16[32,256], index: 7, kind: input, shape index: {}]   ;;  %s2081_s8 = inlined_call_operand.vmem [shape: f32[1,256], index: 8, kind: input, shape index: {}]   ;;  %s2082_s9 = inlined_call_operand.vmem [shape: bf16[256,128], index: 9, kind: input, shape index: {}]   ;;  %s2083_s10 = inlined_call_operand.vmem [shape: f32[1,128], index: 10, kind: input, shape index: {}]   ;;  %s2084_s11 = inlined_call_operand.vmem [shape: f32[2,8,128], index: 11, kind: output, shape index: {}]  }
   0x1   :  { %s1814_s19 = smov 0  }
   0x2 LB: > { %s33_s20 = sadd.s32 1, %s1742_s18  ;;  %p1533_p0 = scmp.ge.s32.totalorder %s1746_s19, 1  ;;  %s1746_s19 = sphi %s1814_s19, %s21_s19   ;;  %s1742_s18 = sphi %s1812_s18, %s2086_s18   ;;  %s1738_s17 = sphi %s1810_s17, %s2085_s17  }
   0x3   : > { %p35_p1 = scmp.ge.s32.totalorder %s33_s20, 2  ;;  %p402_p2 = scmp.lt.s32.totalorder %s1746_s19, 3 }
   0x5   : > { %s2088_s20 = smov (%p35_p1, %s33_s20), 0  ;;  %p403_p3 = pnand %p1533_p0, %p402_p2 }
   0x6   : > { %v1678_v0 = vld [vmem:[%s2080_s7 + $0x4] ss:$8 sps:$4 sm:$0xff] (!%p403_p3)   ;;  %p468_p4 = scmp.lt.s32.totalorder (!%p403_p3), %s1738_s17, 1  ;;  %v517_v1 = vlaneseq (!%p403_p3)  ;;  %v1680_v2 = vld [vmem:[%s2080_s7] ss:$8 sps:$4 sm:$0xff] (!%p403_p3)   ;;  %v1748_v3 = vmov (!%p403_p3), 0  }
   0x7   : > { %406 = sbr.rel (%p403_p3) target bundleno = 572 (0x23c), region = 64  ;;  %779 = vmatprep.mubr.bf16.mxu1 (!%p403_p3), %v1748_v3  ;;  %747 = vmatprep.subr.bf16.mxu1 (!%p403_p3), %v1678_v0  ;;  %v1681_v4 = vld [vmem:[%s2080_s7 + $0x14] ss:$8 sps:$4 sm:$0xff] (!%p403_p3)   ;;  %v1683_v5 = vld [vmem:[%s2080_s7 + $0x10] ss:$8 sps:$4 sm:$0xff] (!%p403_p3)   ;;  %v1685_v9 = vld [vmem:[%s2078_s5] sm:$0xff] (!%p403_p3)  }
   0x8   : > { %v1749_v6 = vmov (!%p403_p3), 1966171168   ;;  %v1843_v8 = vshrl.u32 (!%p403_p3), %v517_v1, 7  ;;  %748 = vmatpush1.bf16.msra.mxu1 (!%p403_p3), %v1680_v2  ;;  %1624 = vmatprep.subr.bf16.mxu0 (!%p403_p3), %v1685_v9  ;;  %v1686_v11 = vld [vmem:[%s2078_s5 + $0x8] sm:$0xff] (!%p403_p3)   ;;  %v1687_v14 = vld [vmem:[%s2082_s9 + $0x40] sm:$0xff] (!%p403_p3)   ;;  %vm645_vm0 = vcmask (!%p403_p3), 261120  }
   0x9   : > { %v515_v7 = vunpack.c.l.s4 (!%p403_p3), %v1749_v6  ;;  %749 = vmatprep.subr.bf16.mxu1 (!%p403_p3), %v1681_v4  ;;  %1625 = vmatpush3.bf16.msra.mxu0 (!%p403_p3), %v1685_v9  ;;  %v1688_v51 = vld [vmem:[%s2082_s9] sm:$0xff] (!%p403_p3)   ;;  %v1689_v55 = vld [vmem:[%s2082_s9 + $0x48] sm:$0xff] (!%p403_p3)   ;;  %v1691_v60 = vld [vmem:[%s2082_s9 + $0x50] sm:$0xff] (!%p403_p3)   ;;  %vm1359_vm1 = vcmask (!%p403_p3), 1041409   ;;  %vm1361_vm2 = vcmask (!%p403_p3), 1042434   ;;  %vm1363_vm3 = vcmask (!%p403_p3), 1043459  }
   0xa   : > { %1626 = vmatprep.subr.bf16.mxu0 (!%p403_p3), %v1686_v11  ;;  %v1870_v17 = vsub.s32 (!%p403_p3), 0, %v1843_v8  ;;  %v1690_v57 = vld [vmem:[%s2082_s9 + $0x8] sm:$0xff] (!%p403_p3)   ;;  %v1692_v61 = vld [vmem:[%s2082_s9 + $0x10] sm:$0xff] (!%p403_p3)   ;;  %v1693_v63 = vld [vmem:[%s2082_s9 + $0x58] sm:$0xff] (!%p403_p3)   ;;  %vm1365_vm4 = vcmask (!%p403_p3), 1044484   ;;  %vm1367_vm5 = vcmask (!%p403_p3), 1045509  }
   0xb   : > { %v516_v10 = vunpack.c.0.s8 (!%p403_p3), %v515_v7  ;;  %v1694_v0 = vld [vmem:[%s2082_s9 + $0x18] sm:$0xff] (!%p403_p3)   ;;  %v1695_v1 = vld [vmem:[%s2082_s9 + $0x60] sm:$0xff] (!%p403_p3)   ;;  %v1699_v4 = vld [vmem:[%s2082_s9 + $0x68] sm:$0xff] (!%p403_p3)   ;;  %vm1369_vm6 = vcmask (!%p403_p3), 1046534   ;;  %vm1371_vm7 = vcmask (!%p403_p3), 1047559  }
   0xc   : > { %750 = vmatpush1.bf16.msra.mxu1 (!%p403_p3), %v1683_v5  ;;  %v1698_v2 = vld [vmem:[%s2082_s9 + $0x20] sm:$0xff] (!%p403_p3)   ;;  %v1700_v5 = vld [vmem:[%s2082_s9 + $0x28] sm:$0xff] (!%p403_p3)   ;;  %v1702_v6 = vld [vmem:[%s2082_s9 + $0x30] sm:$0xff] (!%p403_p3)  }
   0xd   : > { %v1859_v13 = vsub.s32 (!%p403_p3), %v516_v10, %v1843_v8  ;;  %1636 = vmatprep.subr.bf16.mxu1 (!%p403_p3), %v1687_v14  ;;  %1627 = vmatpush3.bf16.msra.mxu0 (!%p403_p3), %v1686_v11  ;;  %v1703_v7 = vld [vmem:[%s2082_s9 + $0x78] sm:$0xff] (!%p403_p3)  }
   0xe   : > { %s2090_s17 = smov (!%p468_p4, %s1738_s17), 1  ;;  %1584 = vmatprep.subr.bf16.mxu0 %v1687_v14  ;;  %v1704_v9 = vld [vmem:[%s2082_s9 + $0x38] sm:$0xff]  }
   0xf   : > { %s1849_s12 = sshll.u32 %s2090_s17, 3  ;;  %s1576_s27 = sshll.u32 %s2090_s17, 4 }
  0x10   : > { %s492_s15 = scalar_lea.vmem %s2076_s3, %s1849_s12  ;;  %s499_s26 = scalar_lea.vmem %s2077_s4, %s1849_s12 }
  0x11   : > { %v510_v12 = vld [vmem:[%s492_s15] sm:$0xff]  ;;  %s1887_s30 = scalar_lea.vmem %s2074_s1, %s1576_s27  ;;  %s488_s25 = scalar_lea.vmem %s2075_s2, %s1576_s27 }
  0x12   : > { %v513_v15 = vcombine.high %v510_v12, %v510_v12  ;;  %v520_v16 = vrot.slane %v510_v12, %v1859_v13  ;;  %v511_v21 = vld [vmem:[%s499_s26] sm:$0xff]  ;;  %s474_s15 = scalar_lea.vmem %s2073_s0, %s1849_s12  ;;  %s503_s22 = scalar_lea.vmem %s2084_s11, %s1849_s12 }
  0x13   : > { %v1696_v10 = vld [vmem:[%s1887_s30] ss:$8 sps:$4 sm:$0xff]  }
  0x14   : > { %v527_v18 = vrot.slane %v513_v15, %v1859_v13  ;;  %v528_v19 = vcombine.high %v520_v16, %v520_v16  ;;  %v536_v20 = vrot.slane %v520_v16, %v1859_v13  ;;  %v830_v11 = vrot.slane %v1696_v10, %v1859_v13 }
  0x15   : > { %v1953_v15 = vsub.s32 1, %v1843_v8  ;;  %v1968_v8 = vld [vmem:[%s488_s25] sm:$0xff] }
  0x16   : > { %v529_v22 = vcombine.high %v527_v18, %v527_v18  ;;  %v543_v23 = vrot.slane %v527_v18, %v1859_v13  ;;  %v550_v24 = vrot.slane %v528_v19, %v1859_v13  ;;  %v565_v25 = vrot.slane %v536_v20, %v1870_v17  ;;  %v984_v19 = vld [vmem:[%s2081_s8] sm:$0x3] }
  0x17   : > { %v558_v26 = vcombine.high %v536_v20, %v536_v20  ;;  %v838_v12 = vcombine.high %v830_v11, %v830_v11  ;;  %v846_v14 = vrot.slane %v830_v11, %v1859_v13 }
  0x18   : > { %v557_v27 = vrot.slane %v529_v22, %v1859_v13  ;;  %v581_v28 = vrot.slane %v543_v23, %v1870_v17  ;;  %v559_v29 = vcombine.high %v543_v23, %v543_v23  ;;  %v569_v30 = vrot.slane %v550_v24, %v1870_v17  ;;  %v1705_v22 = vld [vmem:[%s1887_s30 + $0x4] ss:$8 sps:$4 sm:$0xff]  }
  0x19   : > { %v602_v31 = vsub.f32 %v565_v25, %v511_v21  ;;  %v560_v32 = vcombine.high %v550_v24, %v550_v24  ;;  %v573_v33 = vrot.slane %v558_v26, %v1870_v17  ;;  %v860_v16 = vrot.slane %v838_v12, %v1859_v13  ;;  %v1971_v25 = vld [vmem:[%s488_s25 + $0x8] sm:$0xff] }
  0x1a   : > { %v585_v34 = vrot.slane %v557_v27, %v1870_v17  ;;  %v606_v35 = vsub.f32 %v581_v28, %v511_v21  ;;  %v561_v36 = vcombine.high %v557_v27, %v557_v27  ;;  %v603_v37 = vsub.f32 %v569_v30, %v511_v21 }
  0x1b   : > { %v610_v38 = vmax.f32 %v602_v31, 0.0  ;;  %v577_v39 = vrot.slane %v560_v32, %v1870_v17  ;;  %v604_v40 = vsub.f32 %v573_v33, %v511_v21  ;;  %v589_v42 = vrot.slane %v559_v29, %v1870_v17 }
  0x1c   : > { %v607_v41 = vsub.f32 %v585_v34, %v511_v21  ;;  %v611_v43 = vmax.f32 %v603_v37, 0.0  ;;  %v593_v46 = vrot.slane %v561_v36, %v1870_v17  ;;  %v614_v47 = vmax.f32 %v606_v35, 0.0 }
  0x1d   : > { %v605_v44 = vsub.f32 %v577_v39, %v511_v21  ;;  %v612_v45 = vmax.f32 %v604_v40, 0.0  ;;  %v608_v53 = vsub.f32 %v589_v42, %v511_v21  ;;  %v875_v18 = vrot.slane %v846_v14, %v1870_v17 }
  0x1e   : > { %v615_v48 = vmax.f32 %v607_v41, 0.0  ;;  %v618_v49 = vpack.c.bf16 %v611_v43, %v610_v38  ;;  %v609_v54 = vsub.f32 %v593_v46, %v511_v21  ;;  %v879_v20 = vrot.slane %v846_v14, %v1953_v15 }
  0x1f   : > { %v613_v50 = vmax.f32 %v605_v44, 0.0  ;;  %v616_v58 = vmax.f32 %v608_v53, 0.0  ;;  %v883_v21 = vrot.slane %v860_v16, %v1870_v17  ;;  %v887_v24 = vrot.slane %v860_v16, %v1953_v15 }
  0x20   : > { %1553 = vmatmul.mubr.msk.bf16.vlgmr.msra.gmra.mrb[0].mxu1 %vm645_vm0, %v618_v49  ;;  %1628 = vmatprep.mubr.msk.bf16.mxu0 %vm645_vm0, %v618_v49  ;;  %v620_v56 = vpack.c.bf16 %v615_v48, %v614_v47  ;;  %v617_v59 = vmax.f32 %v609_v54, 0.0  ;;  %v1974_v27 = vrot.slane %v984_v19, %v1870_v17  ;;  %v868_v29 = vcombine.high %v846_v14, %v846_v14 }
  0x21   : > { %v619_v52 = vpack.c.bf16 %v613_v50, %v612_v45  ;;  %789 = vmatprep.mubr.bf16.mxu1 %v1748_v3  ;;  %1644 = vmatpush3.bf16.msra.mxu1 %v1688_v51  ;;  %v1977_v31 = vrot.slane %v984_v19, %v1953_v15  ;;  %v870_v37 = vcombine.high %v860_v16, %v860_v16 }
  0x22   : > { %1637 = vmatprep.subr.bf16.mxu1 %v1689_v55  ;;  %v621_v62 = vpack.c.bf16 %v617_v59, %v616_v58  ;;  %v837_v38 = vrot.slane %v1705_v22, %v1859_v13  ;;  %v891_v45 = vrot.slane %v868_v29, %v1870_v17  ;;  %v895_v49 = vrot.slane %v868_v29, %v1953_v15 }
  0x23   : > { %1629 = vmatmul.mubr.msk.bf16.vlgmr.msra.gmra.mrb[0].mxu0 %vm645_vm0, %v619_v52 }
  0x24   : > { %1585 = vmatpush3.bf16.msra.mxu0 %v1688_v51  ;;  %1632 = vmatprep.mubr.msk.bf16.mxu0 %vm645_vm0, %v620_v56  ;;  %v899_v51 = vrot.slane %v870_v37, %v1870_v17 }
  0x25   : > { %1586 = vmatprep.subr.bf16.mxu0 %v1689_v55  ;;  %1645 = vmatpush3.bf16.msra.mxu1 %v1690_v57  ;;  %v903_v55 = vrot.slane %v870_v37, %v1953_v15 }
  0x26   : > { %1638 = vmatprep.subr.bf16.mxu1 %v1691_v60 }
  0x28   : > { %1587 = vmatpush3.bf16.msra.mxu0 %v1690_v57  ;;  %1554 = vmatmul.mubr.msk.bf16.gmra.mrb[4].mxu1 %vm645_vm0, %v619_v52  ;;  %v839_v52 = vcombine.high %v837_v38, %v837_v38 }
  0x29   : > { %1588 = vmatprep.subr.bf16.mxu0 %v1691_v60  ;;  %799 = vmatprep.mubr.bf16.mxu1 %v1748_v3  ;;  %v853_v60 = vrot.slane %v837_v38, %v1859_v13 }
  0x2a   : > { %1646 = vmatpush3.bf16.msra.mxu1 %v1692_v61 }
  0x2b   : > { %1633 = vmatmul.mubr.msk.bf16.gmra.mrb[4].mxu0 %vm645_vm0, %v621_v62  ;;  %1639 = vmatprep.subr.bf16.mxu1 %v1693_v63 }
  0x2c   : > { %1589 = vmatpush3.bf16.msra.mxu0 %v1692_v61 }
  0x2d   : > { %1590 = vmatprep.subr.bf16.mxu0 %v1693_v63 }
  0x2e   : > { %1647 = vmatpush3.bf16.msra.mxu1 %v1694_v0 }
  0x2f   : > { %1640 = vmatprep.subr.bf16.mxu1 %v1695_v1 }
  0x30   : > { %1591 = vmatpush3.bf16.msra.mxu0 %v1694_v0  ;;  %1555 = vmatmul.mubr.msk.bf16.gmra.mrb[8].mxu1 %vm645_vm0, %v620_v56 }
  0x31   : > { %1592 = vmatprep.subr.bf16.mxu0 %v1695_v1  ;;  %809 = vmatprep.mubr.bf16.mxu1 %v1748_v3  ;;  %v1701_v3 = vld [vmem:[%s2082_s9 + $0x70] sm:$0xff]  }
  0x32   : > { %1648 = vmatpush3.bf16.msra.mxu1 %v1698_v2 }
  0x33   : > { %1641 = vmatprep.subr.bf16.mxu1 %v1699_v4 }
  0x34   : > { %1593 = vmatpush3.bf16.msra.mxu0 %v1698_v2 }
  0x35   : > { %1594 = vmatprep.subr.bf16.mxu0 %v1699_v4 }
  0x36   : > { %1649 = vmatpush3.bf16.msra.mxu1 %v1700_v5 }
  0x37   : > { %1642 = vmatprep.subr.bf16.mxu1 %v1701_v3 }
  0x38   : > { %1556 = vmatmul.mubr.msk.bf16.gmra.mrb[12].mxu1 %vm645_vm0, %v621_v62  ;;  %1595 = vmatpush3.bf16.msra.mxu0 %v1700_v5 }
  0x39   : > { %1596 = vmatprep.subr.bf16.mxu0 %v1701_v3 }
  0x3a   : > { %1650 = vmatpush3.bf16.msra.mxu1 %v1702_v6 }
  0x3b   : > { %1643 = vmatprep.subr.bf16.mxu1 %v1703_v7 }
  0x3c   : > { %1597 = vmatpush3.bf16.msra.mxu0 %v1702_v6  ;;  %v867_v6 = vrot.slane %v839_v52, %v1859_v13 }
  0x3d   : > { %1598 = vmatprep.subr.bf16.mxu0 %v1703_v7 }
  0x3e   : > { %1651 = vmatpush3.bf16.msra.mxu1 %v1704_v9 }
  0x40   : > { %1599 = vmatpush3.bf16.msra.mxu0 %v1704_v9 }
  0xf3   : > { %v781_v23 = vpop.f32.mrb[0].mxu1 }
  0xf4   : > { %v952_v26 = vadd.f32 %v875_v18, %v781_v23  ;;  %v783_v28 = vpop.f32.mrb[1].mxu1  ;;  %v907_v18 = vrot.slane %v853_v60, %v1870_v17  ;;  %v915_v23 = vrot.slane %v867_v6, %v1870_v17 }
  0xf5   : > { %v953_v30 = vadd.f32 %v879_v20, %v783_v28  ;;  %v785_v32 = vpop.f32.mrb[2].mxu1  ;;  %v919_v28 = vrot.slane %v867_v6, %v1953_v15 }
  0xf6   : > { %v1979_v33 = vpop.f32.mrb[0].mxu0  ;;  %v968_v34 = vsub.f32 %v952_v26, %v1968_v8  ;;  %v954_v35 = vadd.f32 %v883_v21, %v785_v32  ;;  %v787_v36 = vpop.f32.mrb[3].mxu1  ;;  %v911_v21 = vrot.slane %v853_v60, %v1953_v15 }
  0xf7   : > { %v1983_v39 = vpop.f32.mrb[1].mxu0  ;;  %v969_v40 = vsub.f32 %v953_v30, %v1971_v25  ;;  %v955_v41 = vadd.f32 %v887_v24, %v787_v36 }
  0xf8   : > { %v1986_v42 = vpop.f32.mrb[2].mxu0  ;;  %v996_v43 = vadd.f32 %v1974_v27, %v968_v34  ;;  %v970_v44 = vsub.f32 %v954_v35, %v1968_v8  ;;  %v869_v35 = vcombine.high %v853_v60, %v853_v60 }
  0xf9   : > { %v1991_v46 = vpop.f32.mrb[3].mxu0  ;;  %v997_v47 = vadd.f32 %v1977_v31, %v969_v40  ;;  %v971_v48 = vsub.f32 %v955_v41, %v1971_v25 }
  0xfa   : > { %v998_v50 = vadd.f32 %v1974_v27, %v970_v44  ;;  %v1012_v56 = vmax.f32 %v996_v43, 0.0 }
  0xfb   : > { %v999_v53 = vadd.f32 %v1977_v31, %v971_v48  ;;  %v791_v54 = vpop.f32.mrb[4].mxu1  ;;  %v1013_v61 = vmax.f32 %v997_v47, 0.0  ;;  %v871_v47 = vcombine.high %v867_v6, %v867_v6 }
  0xfc   : > { %v1014_v57 = vmax.f32 %v998_v50, 0.0  ;;  %v956_v58 = vadd.f32 %v891_v45, %v791_v54  ;;  %v793_v59 = vpop.f32.mrb[5].mxu1 }
  0xfd   : > { %v1015_v62 = vmax.f32 %v999_v53, 0.0  ;;  %v957_v63 = vadd.f32 %v895_v49, %v793_v59  ;;  %v795_v0 = vpop.f32.mrb[6].mxu1  ;;  %v923_v53 = vrot.slane %v869_v35, %v1870_v17 }
  0xfe   : > { %v2001_v1 = vpop.f32.mrb[4].mxu0  ;;  %v1028_v2 = vpack.c.bf16 %v1014_v57, %v1012_v56  ;;  %v972_v4 = vsub.f32 %v956_v58, %v1968_v8  ;;  %v958_v5 = vadd.f32 %v899_v51, %v795_v0  ;;  %v797_v3 = vpop.f32.mrb[7].mxu1  ;;  %v927_v56 = vrot.slane %v869_v35, %v1953_v15 }
  0xff   : > { %v2005_v7 = vpop.f32.mrb[5].mxu0  ;;  %v973_v9 = vsub.f32 %v957_v63, %v1971_v25  ;;  %v959_v10 = vadd.f32 %v903_v55, %v797_v3  ;;  %v1029_v11 = vpack.c.bf16 %v1015_v62, %v1013_v61  ;;  %v931_v58 = vrot.slane %v871_v47, %v1870_v17 }
 0x100   : > { %v2008_v12 = vpop.f32.mrb[6].mxu0  ;;  %v1000_v14 = vadd.f32 %v1974_v27, %v972_v4  ;;  %v974_v16 = vsub.f32 %v958_v5, %v1968_v8  ;;  %v935_v61 = vrot.slane %v871_v47, %v1953_v15 }
 0x101   : > { %v2013_v19 = vpop.f32.mrb[7].mxu0  ;;  %v1001_v20 = vadd.f32 %v1977_v31, %v973_v9  ;;  %v975_v13 = vsub.f32 %v959_v10, %v1971_v25  ;;  %1203 = vmatprep.mubr.bf16.mxu0 %v1029_v11 }
 0x102   : > { %v1002_v22 = vadd.f32 %v1974_v27, %v974_v16  ;;  %1204 = vmatmul.mubr.bf16.vlgmr.msra.gmra.mrb[8].mxu0 %v1028_v2  ;;  %v1016_v29 = vmax.f32 %v1000_v14, 0.0 }
 0x103   : > { %v1003_v24 = vadd.f32 %v1977_v31, %v975_v13  ;;  %v801_v26 = vpop.f32.mrb[8].mxu1  ;;  %v1017_v36 = vmax.f32 %v1001_v20, 0.0 }
 0x104   : > { %v1018_v30 = vmax.f32 %v1002_v22, 0.0  ;;  %v960_v32 = vadd.f32 %v907_v18, %v801_v26  ;;  %v803_v34 = vpop.f32.mrb[9].mxu1 }
 0x105   : > { %v1019_v37 = vmax.f32 %v1003_v24, 0.0  ;;  %v961_v38 = vadd.f32 %v911_v21, %v803_v34  ;;  %v805_v40 = vpop.f32.mrb[10].mxu1 }
 0x106   : > { %v976_v41 = vsub.f32 %v960_v32, %v1968_v8  ;;  %v962_v43 = vadd.f32 %v915_v23, %v805_v40  ;;  %v807_v44 = vpop.f32.mrb[11].mxu1  ;;  %v1030_v45 = vpack.c.bf16 %v1018_v30, %v1016_v29 }
 0x107   : > { %v977_v48 = vsub.f32 %v961_v38, %v1971_v25  ;;  %v963_v49 = vadd.f32 %v919_v28, %v807_v44  ;;  %v1031_v50 = vpack.c.bf16 %v1019_v37, %v1017_v36 }
 0x108   : > { %v1004_v51 = vadd.f32 %v1974_v27, %v976_v41  ;;  %v978_v52 = vsub.f32 %v962_v43, %v1968_v8 }
 0x109   : > { %v1005_v54 = vadd.f32 %v1977_v31, %v977_v48  ;;  %v979_v55 = vsub.f32 %v963_v49, %v1971_v25  ;;  %1211 = vmatprep.mubr.bf16.mxu0 %v1031_v50 }
 0x10a   : > { %v1006_v57 = vadd.f32 %v1974_v27, %v978_v52  ;;  %1212 = vmatmul.mubr.bf16.gmra.mrb[12].mxu0 %v1030_v45  ;;  %v1020_v62 = vmax.f32 %v1004_v51, 0.0  ;;  %v1557_v45 = vld [vmem:[%s2083_s10] ss:$0 sm:$0xff] }
 0x10b   : > { %v1007_v59 = vadd.f32 %v1977_v31, %v979_v55  ;;  %v811_v60 = vpop.f32.mrb[12].mxu1  ;;  %v1021_v4 = vmax.f32 %v1005_v54, 0.0 }
 0x10c   : > { %v1022_v63 = vmax.f32 %v1006_v57, 0.0  ;;  %v964_v0 = vadd.f32 %v923_v53, %v811_v60  ;;  %v813_v2 = vpop.f32.mrb[13].mxu1 }
 0x10d   : > { %v1023_v5 = vmax.f32 %v1007_v59, 0.0  ;;  %v965_v3 = vadd.f32 %v927_v56, %v813_v2  ;;  %v815_v6 = vpop.f32.mrb[14].mxu1 }
 0x10e   : > { %v1032_v9 = vpack.c.bf16 %v1022_v63, %v1020_v62  ;;  %v980_v10 = vsub.f32 %v964_v0, %v1968_v8  ;;  %v966_v11 = vadd.f32 %v931_v58, %v815_v6  ;;  %v817_v14 = vpop.f32.mrb[15].mxu1 }
 0x10f   : > { %v981_v17 = vsub.f32 %v965_v3, %v1971_v25  ;;  %v967_v16 = vadd.f32 %v935_v61, %v817_v14  ;;  %v1033_v18 = vpack.c.bf16 %v1023_v5, %v1021_v4 }
 0x110   : > { %v1008_v20 = vadd.f32 %v1974_v27, %v980_v10  ;;  %v982_v15 = vsub.f32 %v966_v11, %v1968_v8 }
 0x111   : > { %v1009_v13 = vadd.f32 %v1977_v31, %v981_v17  ;;  %v983_v21 = vsub.f32 %v967_v16, %v1971_v25  ;;  %1219 = vmatprep.mubr.bf16.mxu1 %v1033_v18 }
 0x112   : > { %v1010_v22 = vadd.f32 %v1974_v27, %v982_v15  ;;  %1220 = vmatmul.mubr.bf16.vlgmr.msra.gmra.mrb[16].mxu1 %v1032_v9  ;;  %v1024_v24 = vmax.f32 %v1008_v20, 0.0 }
 0x113   : > { %v1011_v23 = vadd.f32 %v1977_v31, %v983_v21  ;;  %v1025_v28 = vmax.f32 %v1009_v13, 0.0 }
 0x114   : > { %v1026_v26 = vmax.f32 %v1010_v22, 0.0 }
 0x115   : > { %v1027_v29 = vmax.f32 %v1011_v23, 0.0 }
 0x116   : > { %v1034_v30 = vpack.c.bf16 %v1026_v26, %v1024_v24 }
 0x117   : > { %v1035_v32 = vpack.c.bf16 %v1027_v29, %v1025_v28 }
 0x119   : > { %1227 = vmatprep.mubr.bf16.mxu1 %v1035_v32 }
 0x11a   : > { %1228 = vmatmul.mubr.bf16.gmra.mrb[20].mxu1 %v1034_v30 }
 0x1d5   : > { %v1600_v34 = vpop.f32.mrb[8].mxu0 }
 0x1d6   : > { %v1601_v8 = vpop.f32.mrb[9].mxu0 }
 0x1d7   : > { %v1602_v35 = vadd.f32 %v1601_v8, %v1600_v34  ;;  %v1603_v36 = vpop.f32.mrb[10].mxu0 }
 0x1d8   : > { %v1604_v37 = vpop.f32.mrb[11].mxu0 }
 0x1d9   : > { %v1605_v25 = vadd.f32 %v1604_v37, %v1603_v36  ;;  %v1206_v51 = vadd.f32 %v1602_v35, %v1557_v45 }
 0x1db   : > { %v1209_v54 = vadd.f32 %v1605_v25, %v1557_v45 }
 0x1dd   : > { %v1606_v38 = vpop.f32.mrb[12].mxu0 }
 0x1de   : > { %v1607_v40 = vpop.f32.mrb[13].mxu0 }
 0x1df   : > { %v1608_v27 = vadd.f32 %v1607_v40, %v1606_v38  ;;  %v1609_v41 = vpop.f32.mrb[14].mxu0 }
 0x1e0   : > { %v1610_v43 = vpop.f32.mrb[15].mxu0 }
 0x1e1   : > { %v1611_v31 = vadd.f32 %v1610_v43, %v1609_v41  ;;  %v1214_v0 = vadd.f32 %v1608_v27, %v1557_v45 }
 0x1e3   : > { %v1217_v5 = vadd.f32 %v1611_v31, %v1557_v45 }
 0x1e5   : > { %v1612_v44 = vpop.f32.mrb[16].mxu1 }
 0x1e6   : > { %v1613_v47 = vpop.f32.mrb[17].mxu1 }
 0x1e7   : > { %v1614_v48 = vadd.f32 %v1613_v47, %v1612_v44  ;;  %v1615_v49 = vpop.f32.mrb[18].mxu1 }
 0x1e8   : > { %v1616_v50 = vpop.f32.mrb[19].mxu1 }
 0x1e9   : > { %v1222_v52 = vadd.f32 %v1614_v48, %v1557_v45  ;;  %v1617_v53 = vadd.f32 %v1616_v50, %v1615_v49  ;;  %v1542_v48 = vld [vmem:[%s2079_s6] ss:$0 sm:$0xff] }
 0x1ea   : > { %v701_v49 = vadd.f32 %v1979_v33, %v1542_v48  ;;  %v693_v50 = vadd.f32 %v1542_v48, %v1983_v39 }
 0x1eb   : > { %v1236_v55 = vmax.f32 %v1206_v51, %v1222_v52  ;;  %v1225_v56 = vadd.f32 %v1617_v53, %v1557_v45  ;;  %v505_v53 = vld [vmem:[%s474_s15] sm:$0xff] }
 0x1ed   : > { %v1237_v57 = vmax.f32 %v1209_v54, %v1225_v56  ;;  %v1618_v58 = vpop.f32.mrb[20].mxu1 }
 0x1ee   : > { %v1619_v59 = vpop.f32.mrb[21].mxu1 }
 0x1ef   : > { %v1240_v60 = vmax.f32 %v1236_v55, %v1237_v57  ;;  %v1620_v61 = vadd.f32 %v1619_v59, %v1618_v58  ;;  %v1621_v62 = vpop.f32.mrb[22].mxu1  ;;  %v709_v55 = vadd.f32 %v1542_v48, %v2005_v7  ;;  %v712_v57 = vadd.f32 %v1542_v48, %v2013_v19 }
 0x1f0   : > { %v1622_v63 = vpop.f32.mrb[23].mxu1  ;;  %v1285_v58 = vadd.f32 %v701_v49, %v505_v53  ;;  %v1283_v59 = vadd.f32 %v693_v50, %v505_v53 }
 0x1f1   : > { %v1230_v2 = vadd.f32 %v1620_v61, %v1557_v45  ;;  %v1623_v4 = vadd.f32 %v1622_v63, %v1621_v62  ;;  %v1287_v39 = vadd.f32 %v709_v55, %v505_v53 }
 0x1f3   : > { %v1238_v3 = vmax.f32 %v1214_v0, %v1230_v2  ;;  %v1233_v6 = vadd.f32 %v1623_v4, %v1557_v45 }
 0x1f5   : > { %v1239_v9 = vmax.f32 %v1217_v5, %v1233_v6 }
 0x1f7   : > { %v1241_v10 = vmax.f32 %v1238_v3, %v1239_v9 }
 0x1f9   : > { %v1242_v11 = vmax.f32 %v1240_v60, %v1241_v10 }
 0x1fb   : > { %v1243_v14 = vsub.f32 %v1206_v51, %v1242_v11  ;;  %v1244_v17 = vsub.f32 %v1209_v54, %v1242_v11  ;;  %v1245_v16 = vsub.f32 %v1214_v0, %v1242_v11  ;;  %v1246_v18 = vsub.f32 %v1217_v5, %v1242_v11 }
 0x1fc   : > { %v1247_v20 = vsub.f32 %v1222_v52, %v1242_v11  ;;  %v1248_v15 = vsub.f32 %v1225_v56, %v1242_v11  ;;  %v1249_v13 = vsub.f32 %v1230_v2, %v1242_v11  ;;  %v1250_v21 = vsub.f32 %v1233_v6, %v1242_v11 }
 0x1fd   : > { %v1251_v22 = vmul.f32 1.442695, %v1243_v14  ;;  %v1253_v23 = vmul.f32 1.442695, %v1244_v17  ;;  %v1255_v24 = vmul.f32 1.442695, %v1245_v16  ;;  %v704_v51 = vadd.f32 %v1986_v42, %v1542_v48 }
 0x1fe   : > { %v1257_v26 = vmul.f32 1.442695, %v1246_v18  ;;  %v1259_v28 = vmul.f32 1.442695, %v1247_v20  ;;  %v1261_v29 = vmul.f32 1.442695, %v1248_v15  ;;  %v696_v52 = vadd.f32 %v1542_v48, %v1991_v46 }
 0x1ff   : > { %1706 = vpow2.f32 %v1251_v22  ;;  %v1263_v30 = vmul.f32 1.442695, %v1249_v13  ;;  %v1265_v32 = vmul.f32 1.442695, %v1250_v21  ;;  %v717_v54 = vadd.f32 %v2001_v1, %v1542_v48 }
 0x200   : > { %1708 = vpow2.f32 %v1253_v23  ;;  %v720_v56 = vadd.f32 %v2008_v12, %v1542_v48  ;;  %v1286_v60 = vadd.f32 %v704_v51, %v505_v53  ;;  %v1284_v61 = vadd.f32 %v696_v52, %v505_v53 }
 0x201   : > { %1710 = vpow2.f32 %v1255_v24  ;;  %v1289_v62 = vadd.f32 %v717_v54, %v505_v53  ;;  %v1288_v42 = vadd.f32 %v712_v57, %v505_v53 }
 0x202   : > { %1712 = vpow2.f32 %v1257_v26  ;;  %v1290_v63 = vadd.f32 %v720_v56, %v505_v53 }
 0x203   : > { %1714 = vpow2.f32 %v1259_v28 }
 0x204   : > { %1716 = vpow2.f32 %v1261_v29 }
 0x205   : > { %1718 = vpow2.f32 %v1263_v30 }
 0x206   : > { %1720 = vpow2.f32 %v1265_v32 }
 0x209   : > { %v1707_v34 = vpop.eup %1706 }
 0x20a   : > { %v1709_v8 = vpop.eup %1708 }
 0x20b   : > { %v1267_v35 = vadd.f32 %v1709_v8, %v1707_v34  ;;  %v1711_v36 = vpop.eup %1710 }
 0x20c   : > { %v1713_v25 = vpop.eup %1712 }
 0x20d   : > { %v1268_v37 = vadd.f32 %v1711_v36, %v1267_v35  ;;  %v1715_v40 = vpop.eup %1714 }
 0x20e   : > { %v1717_v41 = vpop.eup %1716 }
 0x20f   : > { %v1269_v38 = vadd.f32 %v1713_v25, %v1268_v37  ;;  %v1719_v31 = vpop.eup %1718 }
 0x210   : > { %v1721_v45 = vpop.eup %1720 }
 0x211   : > { %v1270_v27 = vadd.f32 %v1715_v40, %v1269_v38 }
 0x213   : > { %v1271_v43 = vadd.f32 %v1717_v41, %v1270_v27 }
 0x215   : > { %v1272_v44 = vadd.f32 %v1719_v31, %v1271_v43 }
 0x217   : > { %v1273_v47 = vadd.f32 %v1721_v45, %v1272_v44 }
 0x219   : > { %1722 = vrcp.f32 %v1273_v47 }
 0x223   : > { %v1723_v33 = vpop.eup %1722 }
 0x224   : > { %v1275_v0 = vmul.f32 %v1723_v33, %v1707_v34  ;;  %v1276_v46 = vmul.f32 %v1723_v33, %v1709_v8  ;;  %v1277_v2 = vmul.f32 %v1723_v33, %v1711_v36  ;;  %v1278_v4 = vmul.f32 %v1723_v33, %v1713_v25 }
 0x225   : > { %v1279_v1 = vmul.f32 %v1723_v33, %v1715_v40  ;;  %v1280_v5 = vmul.f32 %v1723_v33, %v1717_v41  ;;  %v1281_v7 = vmul.f32 %v1723_v33, %v1719_v31  ;;  %v1282_v3 = vmul.f32 %v1723_v33, %v1721_v45 }
 0x226   : > { %v1291_v12 = vmul.f32 %v1283_v59, %v1275_v0  ;;  %v1292_v6 = vmul.f32 %v1284_v61, %v1276_v46  ;;  %v1293_v19 = vmul.f32 %v1285_v58, %v1277_v2  ;;  %v1294_v9 = vmul.f32 %v1286_v60, %v1278_v4 }
 0x227   : > { %v1295_v10 = vmul.f32 %v1287_v39, %v1279_v1  ;;  %v1296_v11 = vmul.f32 %v1288_v42, %v1280_v5  ;;  %v1297_v14 = vmul.f32 %v1289_v62, %v1281_v7  ;;  %v1298_v17 = vmul.f32 %v1290_v63, %v1282_v3 }
 0x228   : > { %v1299_v16 = vrot.slane %v1291_v12, 4  ;;  %v1305_v18 = vrot.slane %v1292_v6, 4  ;;  %v1311_v20 = vrot.slane %v1293_v19, 4  ;;  %v1317_v15 = vrot.slane %v1294_v9, 4 }
 0x229   : > { %v1323_v13 = vrot.slane %v1295_v10, 4  ;;  %v1329_v21 = vrot.slane %v1296_v11, 4  ;;  %v1335_v22 = vrot.slane %v1297_v14, 4  ;;  %v1341_v23 = vrot.slane %v1298_v17, 4 }
 0x22a   : > { %v1300_v24 = vadd.f32 %v1299_v16, %v1291_v12  ;;  %v1306_v26 = vadd.f32 %v1305_v18, %v1292_v6  ;;  %v1312_v28 = vadd.f32 %v1311_v20, %v1293_v19  ;;  %v1318_v29 = vadd.f32 %v1317_v15, %v1294_v9 }
 0x22b   : > { %v1324_v30 = vadd.f32 %v1323_v13, %v1295_v10  ;;  %v1330_v32 = vadd.f32 %v1329_v21, %v1296_v11  ;;  %v1336_v34 = vadd.f32 %v1335_v22, %v1297_v14  ;;  %v1342_v8 = vadd.f32 %v1341_v23, %v1298_v17 }
 0x22c   : > { %v1301_v35 = vrot.slane %v1300_v24, 2  ;;  %v1307_v36 = vrot.slane %v1306_v26, 2  ;;  %v1313_v37 = vrot.slane %v1312_v28, 2  ;;  %v1319_v25 = vrot.slane %v1318_v29, 2 }
 0x22d   : > { %v1325_v38 = vrot.slane %v1324_v30, 2  ;;  %v1331_v40 = vrot.slane %v1330_v32, 2  ;;  %v1337_v27 = vrot.slane %v1336_v34, 2  ;;  %v1343_v41 = vrot.slane %v1342_v8, 2 }
 0x22e   : > { %v1302_v43 = vadd.f32 %v1301_v35, %v1300_v24  ;;  %v1308_v31 = vadd.f32 %v1307_v36, %v1306_v26  ;;  %v1314_v44 = vadd.f32 %v1313_v37, %v1312_v28  ;;  %v1320_v45 = vadd.f32 %v1319_v25, %v1318_v29 }
 0x22f   : > { %v1326_v47 = vadd.f32 %v1325_v38, %v1324_v30  ;;  %v1332_v48 = vadd.f32 %v1331_v40, %v1330_v32  ;;  %v1338_v49 = vadd.f32 %v1337_v27, %v1336_v34  ;;  %v1344_v50 = vadd.f32 %v1343_v41, %v1342_v8 }
 0x230   : > { %v1303_v51 = vrot.slane %v1302_v43, 1  ;;  %v1309_v52 = vrot.slane %v1308_v31, 1  ;;  %v1315_v53 = vrot.slane %v1314_v44, 1  ;;  %v1321_v54 = vrot.slane %v1320_v45, 1 }
 0x231   : > { %v1327_v55 = vrot.slane %v1326_v47, 1  ;;  %v1333_v59 = vrot.slane %v1332_v48, 1  ;;  %v1339_v60 = vrot.slane %v1338_v49, 1  ;;  %v1345_v33 = vrot.slane %v1344_v50, 1 }
 0x232   : > { %v1304_v56 = vadd.f32 %v1303_v51, %v1302_v43  ;;  %v1310_v57 = vadd.f32 %v1309_v52, %v1308_v31  ;;  %v1316_v58 = vadd.f32 %v1315_v53, %v1314_v44  ;;  %v1322_v61 = vadd.f32 %v1321_v54, %v1320_v45 }
 0x233   : > { %v1328_v39 = vadd.f32 %v1327_v55, %v1326_v47  ;;  %v1334_v42 = vadd.f32 %v1333_v59, %v1332_v48  ;;  %v1340_v46 = vadd.f32 %v1339_v60, %v1338_v49  ;;  %v1346_v4 = vadd.f32 %v1345_v33, %v1344_v50 }
 0x234   : > { %v1360_v62 = vsel %vm1359_vm1, %v1310_v57, %v1304_v56 }
 0x235   : > { %v1362_v63 = vsel %vm1361_vm2, %v1316_v58, %v1360_v62 }
 0x236   : > { %v1364_v0 = vsel %vm1363_vm3, %v1322_v61, %v1362_v63 }
 0x237   : > { %v1366_v2 = vsel %vm1365_vm4, %v1328_v39, %v1364_v0 }
 0x238   : > { %v1368_v1 = vsel %vm1367_vm5, %v1334_v42, %v1366_v2 }
 0x239   : > { %v1370_v5 = vsel %vm1369_vm6, %v1340_v46, %v1368_v1 }
 0x23a   : > { %v1372_v7 = vsel %vm1371_vm7, %v1346_v4, %v1370_v5 }
 0x23b   : > { %1374 = vst [vmem:[%s503_s22] sm:$0xff] %v1372_v7 }
 0x23c PF: > { %s21_s19 = sadd.s32 1, %s1746_s19   ;;  %s2085_s17 = smov %s1742_s18 }
 0x23d   : > { %p18_p5 = scmp.ge.s32.totalorder %s21_s19, 4   ;;  %s2086_s18 = smov %s2088_s20 }
 0x23f   :  { %20 = sbr.rel (!%p18_p5) target bundleno = 2 (0x2), region = 114 }

</bundles_post_ra>
